<compile_context>
chip_gen: v7x
topology: tpu7x:2x2x1
jax: 0.10.0
libtpu: 0.0.40
codegen_flags: <defaults>
</compile_context>

<pallas_src>
import functools

import jax
import jax.numpy as jnp
from jax.experimental import pallas as pl
from jax.experimental.pallas import tpu as pltpu


def _round_up(x, m):
    return ((x + m - 1) // m) * m


def _vmem_budget_bytes():
    """Per-core VMEM budget with headroom, derived from the local chip."""
    cap = 64 << 20  # conservative default: v7x per-core VMEM
    try:
        info = pltpu.get_tpu_info()
        cap_attr = getattr(info, "vmem_capacity_bytes", None)
        if cap_attr:
            cap = int(cap_attr)
    except Exception:
        pass
    # ~48 MiB budget on v7x (64 MiB), ~100 MiB on v5e/v6e (128 MiB).
    return max(32 << 20, min(cap - (16 << 20), 100 << 20))


def _ipd_kernel(zi_ref, zt_ref, adj_ref):
    # zi_ref : (TM, D)  row strip / tile of z          (VMEM)
    # zt_ref : (D, TN)  z transposed (full or column-tiled)
    # adj_ref: (TM, TN) output tile
    scores = jnp.dot(
        zi_ref[...], zt_ref[...], preferred_element_type=jnp.float32
    )
    # sigmoid(x) == 0.5 * (tanh(x/2) + 1): one EUP op instead of exp + divide.
    if jnp.dtype(adj_ref.dtype) == jnp.dtype(jnp.bfloat16):
        # bf16 activation: halves EUP cost where it matters (v6e/v7x) and the
        # result is stored at bf16 precision anyway.
        scores = scores.astype(jnp.bfloat16)
    adj = 0.5 * (jnp.tanh(0.5 * scores) + 1.0)
    adj_ref[...] = adj.astype(adj_ref.dtype)


def inner_product_decoder(z, *, dropout=0.0, training=False, rng=None,
                          tm=512, tn=512, out_dtype=None, force_2d=False):
    """adj = sigmoid(dropout(z) @ dropout(z).T), fused in one Pallas kernel.

    z: f32[N, D], any N (no padding required).
    out_dtype: defaults to z.dtype (matches the PyTorch module); pass
      jnp.bfloat16 to halve HBM writeback on this writeback-bound kernel.
    training/dropout/rng: training-mode dropout is applied to the small (N, D)
      input in the wrapper (the mask must be shared between z and z.T).
    """
    N, D = z.shape
    if out_dtype is None:
        out_dtype = z.dtype

    if training and dropout > 0.0:
        if rng is None:
            raise ValueError("training-mode dropout requires an `rng` key")
        keep = jax.random.bernoulli(rng, 1.0 - dropout, z.shape)
        z = jnp.where(keep, z / (1.0 - dropout), jnp.zeros_like(z)).astype(z.dtype)
        # TODO(synk): dropout is applied outside the kernel on the tiny (N, D)
        # input; it is not fused into the Pallas kernel itself.

    out_bytes = jnp.dtype(out_dtype).itemsize
    in_bytes = jnp.dtype(z.dtype).itemsize
    budget = _vmem_budget_bytes()

    # Requested tile sizes, normalized to hardware granularity.
    tm_req = max(8, (min(int(tm), _round_up(N, 8)) // 8) * 8)
    tn_req = max(128, (int(tn) // 128) * 128)

    zt = z.T  # (D, N), transposed once outside the kernel

    # ------------------------------------------------------------------ 1-D
    def fits_1d(tm_):
        # Conservative: count every operand double-buffered (the resident z.T
        # is revisited and only filled once, but budget for two buffers).
        return (2 * tm_ * N * out_bytes          # output strip
                + 2 * tm_ * D * in_bytes         # row strip of z
                + 2 * N * D * in_bytes           # resident z.T
                ) <= budget

    use_2d = bool(force_2d)
    tm1 = tm_req
    if not use_2d:
        while tm1 > 128 and not fits_1d(tm1):
            tm1 = max(8, ((tm1 // 2) // 8) * 8)
        if not fits_1d(tm1):
            use_2d = True  # resident z.T / strips don't fit: go 2-D tiled

    if not use_2d:
        # Nudge tm so the parallel grid is even and >= 2 (v7x: 2 TensorCores).
        g = pl.cdiv(N, tm1)
        if g % 2 == 1 and N > 8:
            tm_even = max(8, _round_up(pl.cdiv(N, g + 1), 8))
            if pl.cdiv(N, tm_even) % 2 == 0 and fits_1d(tm_even):
                tm1 = tm_even
        grid = (pl.cdiv(N, tm1),)

        return pl.pallas_call(
            _ipd_kernel,
            out_shape=jax.ShapeDtypeStruct((N, N), out_dtype),
            grid_spec=pltpu.PrefetchScalarGridSpec(
                num_scalar_prefetch=0,
                grid=grid,
                in_specs=[
                    pl.BlockSpec((tm1, D), lambda i: (i, 0)),   # row strip i
                    pl.BlockSpec((D, N), lambda i: (0, 0)),     # z.T, resident
                ],
                out_specs=pl.BlockSpec((tm1, N), lambda i: (i, 0)),
            ),
            compiler_params=pltpu.CompilerParams(
                dimension_semantics=("parallel",),
                vmem_limit_bytes=budget,
            ),
        )(z, zt)

    # ------------------------------------------------------------------ 2-D
    # Column-tile z.T so nothing has to be fully resident in VMEM.
    tn2 = min(tn_req, _round_up(N, 128))
    if tn2 >= N:
        tn2 = N  # single column block; equal-to-full-dim is always legal
    tm2 = tm_req

    def fits_2d(tm_, tn_):
        return (2 * tm_ * tn_ * out_bytes
                + 2 * tm_ * D * in_bytes
                + 2 * D * tn_ * in_bytes) <= budget

    while tm2 > 8 and not fits_2d(tm2, tn2):
        tm2 = max(8, ((tm2 // 2) // 8) * 8)
    while tn2 > 128 and not fits_2d(tm2, tn2):
        tn2 = max(128, ((tn2 // 2) // 128) * 128)

    grid = (pl.cdiv(N, tm2), pl.cdiv(N, tn2))
    return pl.pallas_call(
        _ipd_kernel,
        out_shape=jax.ShapeDtypeStruct((N, N), out_dtype),
        grid_spec=pltpu.PrefetchScalarGridSpec(
            num_scalar_prefetch=0,
            grid=grid,
            in_specs=[
                pl.BlockSpec((tm2, D), lambda i, j: (i, 0)),    # row tile i
                pl.BlockSpec((D, tn2), lambda i, j: (0, j)),    # column tile j
            ],
            out_specs=pl.BlockSpec((tm2, tn2), lambda i, j: (i, j)),
        ),
        compiler_params=pltpu.CompilerParams(
            dimension_semantics=("parallel", "parallel"),
            vmem_limit_bytes=budget,
        ),
    )(z, zt)


def _reference(z):
    return jax.nn.sigmoid(z @ z.T)


if __name__ == "__main__":
    key = jax.random.PRNGKey(0)
    N, D = 200, 32  # nodes x latent dim (small synthetic, ragged N)
    z = jax.random.normal(key, (N, D), dtype=jnp.float32)
    ref = _reference(z)

    # 1-D row-strip path, f32 output (default; matches the PyTorch module).
    decode = jax.jit(functools.partial(inner_product_decoder))
    adj = jax.block_until_ready(decode(z))
    assert adj.shape == (N, N) and adj.dtype == jnp.float32
    assert jnp.allclose(adj, ref, atol=1e-5, rtol=1e-5)

    # bf16-output fast path (halves HBM writeback; tanh evaluated in bf16).
    decode_bf16 = jax.jit(
        functools.partial(inner_product_decoder, out_dtype=jnp.bfloat16))
    adj_bf16 = jax.block_until_ready(decode_bf16(z))
    assert adj_bf16.dtype == jnp.bfloat16
    assert jnp.allclose(adj_bf16.astype(jnp.float32), ref, atol=3e-2, rtol=3e-2)

    # 2-D tiled fallback (auto-selected when the resident z.T / output strips
    # would not fit VMEM); exercised explicitly here at a ragged size.
    N2, D2 = 600, 32
    z2 = jax.random.normal(jax.random.PRNGKey(1), (N2, D2), dtype=jnp.float32)
    ref2 = _reference(z2)
    decode_2d = jax.jit(functools.partial(
        inner_product_decoder, force_2d=True, tm=256, tn=256))
    adj2 = jax.block_until_ready(decode_2d(z2))
    assert adj2.shape == (N2, N2)
    assert jnp.allclose(adj2, ref2, atol=1e-5, rtol=1e-5)

    print("KERNEL_OK")
</pallas_src>

<mosaic_0001>
module attributes {stable_mosaic.version = 11 : i64} {
  func.func @_ipd_kernel(%arg0: i32, %arg1: memref<104x32xf32, #tpu.memory_space<vmem>>, %arg2: memref<32x200xf32, #tpu.memory_space<vmem>>, %arg3: memref<104x200xf32, #tpu.memory_space<vmem>>) attributes {dimension_semantics = [#tpu.dimension_semantics<parallel>], iteration_bounds = array<i64: 2>, scalar_prefetch = 0 : i64, scratch_operands = 0 : i64, tpu.core_type = #tpu.core_type<tc>, window_params = [{transform_indices = @transform_0, window_bounds = array<i64: 104, 32>}, {pipeline_mode = #tpu.pipeline_mode<synchronous>, transform_indices = @transform_1, window_bounds = array<i64: 32, 200>}, {transform_indices = @transform_2, window_bounds = array<i64: 104, 200>}]} {
    %c0 = arith.constant 0 : index
    %c0_0 = arith.constant 0 : index
    %0 = vector.load %arg1[%c0, %c0_0] : memref<104x32xf32, #tpu.memory_space<vmem>>, vector<104x32xf32>
    %c0_1 = arith.constant 0 : index
    %c0_2 = arith.constant 0 : index
    %1 = vector.load %arg2[%c0_1, %c0_2] : memref<32x200xf32, #tpu.memory_space<vmem>>, vector<32x200xf32>
    %cst = arith.constant dense<0.000000e+00> : vector<104x200xf32>
    %2 = tpu.matmul %0, %1, %cst {dimension_numbers = #tpu.dot_dimension_numbers<[1], [0], [0], [1], [0, 0, 1, 1], [], []>} : vector<104x32xf32>, vector<32x200xf32>, vector<104x200xf32> -> vector<104x200xf32>
    %cst_3 = arith.constant 5.000000e-01 : f32
    %3 = vector.broadcast %cst_3 : f32 to vector<104x200xf32>
    %4 = arith.mulf %3, %2 : vector<104x200xf32>
    %5 = math.tanh %4 : vector<104x200xf32>
    %cst_4 = arith.constant 1.000000e+00 : f32
    %6 = vector.broadcast %cst_4 : f32 to vector<104x200xf32>
    %7 = arith.addf %5, %6 : vector<104x200xf32>
    %cst_5 = arith.constant 5.000000e-01 : f32
    %8 = vector.broadcast %cst_5 : f32 to vector<104x200xf32>
    %9 = arith.mulf %8, %7 : vector<104x200xf32>
    %c0_6 = arith.constant 0 : index
    %c0_7 = arith.constant 0 : index
    %10 = vector.load %arg3[%c0_6, %c0_7] : memref<104x200xf32, #tpu.memory_space<vmem>>, vector<104x200xf32>
    tpu.vector_store %arg3[%c0_6, %c0_7], %9 {strides = array<i32>} : memref<104x200xf32, #tpu.memory_space<vmem>>, vector<104x200xf32>,
    return
  }
  func.func @transform_0(%arg0: i32) -> (i32, i32) {
    %c0_i32 = arith.constant 0 : i32
    %c0_i32_0 = arith.constant 0 : i32
    return %arg0, %c0_i32 : i32, i32
  }
  func.func @transform_1(%arg0: i32) -> (i32, i32) {
    %c0_i32 = arith.constant 0 : i32
    %c0_i32_0 = arith.constant 0 : i32
    %c0_i32_1 = arith.constant 0 : i32
    return %c0_i32, %c0_i32_0 : i32, i32
  }
  func.func @transform_2(%arg0: i32) -> (i32, i32) {
    %c0_i32 = arith.constant 0 : i32
    %c0_i32_0 = arith.constant 0 : i32
    return %arg0, %c0_i32 : i32, i32
  }
}

</mosaic_0001>

<bundles_post_ra>
// kernel: inner_product_decoder.1
= control target key start
LH: loop header
LB: loop body
LE: loop exit
PB: predicated region body
PF: predicated region fallthrough
CT: control target
= control target key end

     0   :  { %7 = vsyncpa [#allocation3], 0  ;;  %s1027_s0 = inlined_call_operand.vmem [shape: f32[200,32], index: 0, kind: input, shape index: {}]   ;;  %s1028_s1 = inlined_call_operand.vmem [shape: f32[32,200], index: 1, kind: input, shape index: {}]   ;;  %s1029_s2 = inlined_call_operand.hbm [shape: f32[200,200], index: 2, kind: output, shape index: {}]  }
   0x1   :  { %9 = vsyncpa [#allocation3 + $0x1], 0  ;;  %s809_s9 = smov 0   ;;  %s811_s10 = smov 0  }
   0x2   :  { %s813_s11 = smov 0   ;;  %s815_s12 = smov 0  }
   0x3 LB: > { %s830_s13 = sadd.s32 4294967295, %s788_s12   ;;  %s589_s14 = sadd.s32 4294967294, %s788_s12   ;;  %s788_s12 = sphi %s815_s12, %s1035_s12   ;;  %s784_s11 = sphi %s813_s11, %s1034_s11   ;;  %s780_s10 = sphi %s811_s10, %s1033_s10   ;;  %s776_s9 = sphi %s809_s9, %s1032_s9  }
   0x4   : > { %s834_s15 = sadd.s32 1, %s788_s12   ;;  %s69_s16 = sadd.s32 1, %s784_s11 }
   0x5   : > { %s66_s17 = ssub.s32 %s788_s12, %s834_s15  ;;  %p79_p0 = scmp.ne.s32.totalorder %s784_s11, %s780_s10 }
   0x6   : > { %p67_p1 = scmp.eq.s32.totalorder %s66_s17, 0  ;;  %p80_p2 = scmp.eq.s32.totalorder %s830_s13, 1 }
   0x7   : > { %p85_p3 = scmp.ne.s32.totalorder %s780_s10, %s776_s9  ;;  %p86_p4 = scmp.eq.s32.totalorder %s589_s14, 1 }
   0x8   : > { %s845_s18 = scalar_select %p67_p1, %s784_s11, %s69_s16  }
   0x9   : > { %p847_p5 = por %p80_p2, %p79_p0  ;;  %p851_p6 = por %p86_p4, %p85_p3 }
   0xa   : > { %p592_p7 = scmp.ge.s32.totalorder %s788_s12, 1  ;;  %p124_p8 = scmp.lt.s32.totalorder %s788_s12, 3 }
   0xc   : > { %p125_p9 = pnand %p592_p7, %p124_p8 }
   0xd   : > { %v184_v0 = vld [vmem:[%s1028_s1 + $0x8] sm:$0xff] (!%p125_p9)  ;;  %v186_v1 = vld [vmem:[%s1028_s1 + $0x18] sm:$0xff] (!%p125_p9)  ;;  %v183_v2 = vld [vmem:[%s1028_s1] sm:$0xff] (!%p125_p9)  ;;  %s867_s27 = smul.u32 (!%p125_p9), 13, %s830_s13  ;;  %v790_v7 = vmov (!%p125_p9), 0.0   ;;  %vm191_vm0 = vcmask (!%p125_p9), 261120  }
   0xe   : > { %128 = sbr.rel (%p125_p9) target bundleno = 310 (0x136), region = 28  ;;  %v620_v3 = vpack.c.bf16 (!%p125_p9), %v186_v1, %v184_v0  ;;  %v185_v4 = vld [vmem:[%s1028_s1 + $0x10] sm:$0xff] (!%p125_p9)  ;;  %v188_v5 = vld [vmem:[%s1028_s1 + $0x28] sm:$0xff] (!%p125_p9)  ;;  %v190_v6 = vld [vmem:[%s1028_s1 + $0x38] sm:$0xff] (!%p125_p9)  ;;  %295 = vmatprep.mubr.f32.mxu0 (!%p125_p9), %v790_v7  ;;  %337 = vmatprep.mubr.f32.mxu1 (!%p125_p9), %v790_v7  ;;  %s147_s24 = sand.u32 (!%p125_p9), 1, %s780_s10   ;;  %vm479_vm1 = vcmask (!%p125_p9), 588800  }
   0xf   : > { %v622_v8 = vpack.c.bf16 (!%p125_p9), %v185_v4, %v183_v2  ;;  %v624_v9 = vpack.c.bf16 (!%p125_p9), %v190_v6, %v188_v5  ;;  %v187_v10 = vld [vmem:[%s1028_s1 + $0x20] sm:$0xff] (!%p125_p9)  ;;  %v189_v11 = vld [vmem:[%s1028_s1 + $0x30] sm:$0xff] (!%p125_p9)  ;;  %p155_p10 = scmp.lt.s32.totalorder (!%p125_p9), %s867_s27, 24  ;;  %s920_s25 = smul.u32 (!%p125_p9), 208, %s147_s24 }
  0x10   : > { %621 = vmatprep.subr.bf16.mxu0 (!%p125_p9), %v620_v3  ;;  %628 = vmatprep.subr.bf16.mxu1 (!%p125_p9), %v620_v3  ;;  %v626_v12 = vpack.c.bf16 (!%p125_p9), %v189_v11, %v187_v10  ;;  %s966_s28 = scalar_lea.sflag (!%p125_p9), [#allocation3], %s147_s24 }
  0x11   : > { %623 = vmatpush1.bf16.msra.mxu0 (!%p125_p9), %v622_v8  ;;  %630 = vmatpush1.bf16.msra.mxu1 (!%p125_p9), %v622_v8  ;;  %s923_s26 = scalar_lea.vmem (!%p125_p9), [#allocation2], %s920_s25 }
  0x12   : > { %625 = vmatprep.subr.bf16.mxu0 (!%p125_p9), %v624_v9  ;;  %629 = vmatprep.subr.bf16.mxu1 (!%p125_p9), %v624_v9 }
  0x15   : > { %s156_s16 = scalar_select %p155_p10, %s867_s27, 24  ;;  %627 = vmatpush1.bf16.msra.mxu0 %v626_v12  ;;  %631 = vmatpush1.bf16.msra.mxu1 %v626_v12 }
  0x16   : > { %s514_s29 = ssub.s32 (%p847_p5), 25, %s867_s27 }
  0x17   : > { %s593_s17 = sshll.u32 %s156_s16, 3  ;;  %p515_p11 = scmp.lt.s32.totalorder (%p847_p5), %s514_s29, 13 }
  0x18   : > { %s889_s23 = scalar_lea.vmem %s1027_s0, %s593_s17 }
  0x19   : > { %v170_v13 = vld [vmem:[%s889_s23] sm:$0xff]  ;;  %v177_v14 = vld [vmem:[%s889_s23 + $0x38] sm:$0xff]  ;;  %v171_v15 = vld [vmem:[%s889_s23 + $0x8] sm:$0xff] }
  0x1a   : > { %594 = vmatmul.mubr.msk.f32.vlgmr.msra.gmra.mrb[0].mxu0 %vm191_vm0, %v170_v13  ;;  %601 = vmatmul.mubr.msk.f32.vlgmr.msra.gmra.mrb[0].mxu1 %vm191_vm0, %v177_v14  ;;  %v178_v16 = vld [vmem:[%s889_s23 + $0x40] sm:$0xff]  ;;  %v172_v17 = vld [vmem:[%s889_s23 + $0x10] sm:$0xff]  ;;  %v179_v18 = vld [vmem:[%s889_s23 + $0x48] sm:$0xff] }
  0x1b   : > { %301 = vmatprep.mubr.f32.mxu0 %v790_v7  ;;  %343 = vmatprep.mubr.f32.mxu1 %v790_v7  ;;  %v173_v19 = vld [vmem:[%s889_s23 + $0x18] sm:$0xff]  ;;  %v180_v20 = vld [vmem:[%s889_s23 + $0x50] sm:$0xff]  ;;  %v174_v21 = vld [vmem:[%s889_s23 + $0x20] sm:$0xff] }
  0x1c   : > { %v181_v22 = vld [vmem:[%s889_s23 + $0x58] sm:$0xff]  ;;  %v175_v23 = vld [vmem:[%s889_s23 + $0x28] sm:$0xff]  ;;  %v182_v24 = vld [vmem:[%s889_s23 + $0x60] sm:$0xff] }
  0x1d   : > { %v176_v25 = vld [vmem:[%s889_s23 + $0x30] sm:$0xff] }
  0x1e   : > { %595 = vmatmul.mubr.msk.f32.gmra.mrb[2].mxu0 %vm191_vm0, %v171_v15  ;;  %602 = vmatmul.mubr.msk.f32.gmra.mrb[2].mxu1 %vm191_vm0, %v178_v16 }
  0x1f   : > { %307 = vmatprep.mubr.f32.mxu0 %v790_v7  ;;  %349 = vmatprep.mubr.f32.mxu1 %v790_v7 }
  0x22   : > { %596 = vmatmul.mubr.msk.f32.gmra.mrb[4].mxu0 %vm191_vm0, %v172_v17  ;;  %603 = vmatmul.mubr.msk.f32.gmra.mrb[4].mxu1 %vm191_vm0, %v179_v18 }
  0x23   : > { %313 = vmatprep.mubr.f32.mxu0 %v790_v7  ;;  %355 = vmatprep.mubr.f32.mxu1 %v790_v7 }
  0x26   : > { %597 = vmatmul.mubr.msk.f32.gmra.mrb[6].mxu0 %vm191_vm0, %v173_v19  ;;  %604 = vmatmul.mubr.msk.f32.gmra.mrb[6].mxu1 %vm191_vm0, %v180_v20 }
  0x27   : > { %319 = vmatprep.mubr.f32.mxu0 %v790_v7  ;;  %361 = vmatprep.mubr.f32.mxu1 %v790_v7 }
  0x2a   : > { %598 = vmatmul.mubr.msk.f32.gmra.mrb[8].mxu0 %vm191_vm0, %v174_v21  ;;  %605 = vmatmul.mubr.msk.f32.gmra.mrb[8].mxu1 %vm191_vm0, %v181_v22 }
  0x2b   : > { %325 = vmatprep.mubr.f32.mxu0 %v790_v7  ;;  %367 = vmatprep.mubr.f32.mxu1 %v790_v7 }
  0x2e   : > { %599 = vmatmul.mubr.msk.f32.gmra.mrb[10].mxu0 %vm191_vm0, %v175_v23  ;;  %606 = vmatmul.mubr.msk.f32.gmra.mrb[10].mxu1 %vm191_vm0, %v182_v24 }
  0x2f   : > { %331 = vmatprep.mubr.f32.mxu0 %v790_v7 }
  0x32   : > { %600 = vmatmul.mubr.msk.f32.gmra.mrb[12].mxu0 %vm191_vm0, %v176_v25 }
  0xed   : > { %v297_v26 = vpop.f32.mrb[0].mxu0  ;;  %v339_v27 = vpop.f32.mrb[0].mxu1 }
  0xee   : > { %v374_v28 = vmul.f32 0.5, %v297_v26  ;;  %v299_v29 = vpop.f32.mrb[1].mxu0  ;;  %v388_v30 = vmul.f32 0.5, %v339_v27  ;;  %v341_v31 = vpop.f32.mrb[1].mxu1 }
  0xef   : > { %v375_v32 = vmul.f32 0.5, %v299_v29  ;;  %v389_v33 = vmul.f32 0.5, %v341_v31 }
  0xf0   : > { %674 = vtanh.f32 %v374_v28 }
  0xf1   : > { %676 = vtanh.f32 %v375_v32  ;;  %v303_v34 = vpop.f32.mrb[2].mxu0  ;;  %v345_v35 = vpop.f32.mrb[2].mxu1 }
  0xf2   : > { %678 = vtanh.f32 %v388_v30  ;;  %v376_v36 = vmul.f32 0.5, %v303_v34  ;;  %v305_v37 = vpop.f32.mrb[3].mxu0  ;;  %v390_v38 = vmul.f32 0.5, %v345_v35  ;;  %v347_v39 = vpop.f32.mrb[3].mxu1 }
  0xf3   : > { %680 = vtanh.f32 %v389_v33  ;;  %v377_v40 = vmul.f32 0.5, %v305_v37  ;;  %v391_v41 = vmul.f32 0.5, %v347_v39 }
  0xf4   : > { %682 = vtanh.f32 %v376_v36 }
  0xf5   : > { %684 = vtanh.f32 %v377_v40  ;;  %v309_v42 = vpop.f32.mrb[4].mxu0  ;;  %v351_v43 = vpop.f32.mrb[4].mxu1 }
  0xf6   : > { %686 = vtanh.f32 %v390_v38  ;;  %v378_v44 = vmul.f32 0.5, %v309_v42  ;;  %v311_v45 = vpop.f32.mrb[5].mxu0  ;;  %v392_v46 = vmul.f32 0.5, %v351_v43  ;;  %v353_v47 = vpop.f32.mrb[5].mxu1 }
  0xf7   : > { %688 = vtanh.f32 %v391_v41  ;;  %v379_v48 = vmul.f32 0.5, %v311_v45  ;;  %v393_v49 = vmul.f32 0.5, %v353_v47 }
  0xf8   : > { %690 = vtanh.f32 %v378_v44 }
  0xf9   : > { %692 = vtanh.f32 %v379_v48  ;;  %v315_v50 = vpop.f32.mrb[6].mxu0  ;;  %v357_v51 = vpop.f32.mrb[6].mxu1 }
  0xfa   : > { %v675_v52 = vpop.eup %674  ;;  %694 = vtanh.f32 %v392_v46  ;;  %v380_v53 = vmul.f32 0.5, %v315_v50  ;;  %v317_v54 = vpop.f32.mrb[7].mxu0  ;;  %v394_v55 = vmul.f32 0.5, %v357_v51 }
  0xfb   : > { %v359_v56 = vpop.f32.mrb[7].mxu1  ;;  %v677_v57 = vpop.eup %676  ;;  %v426_v58 = vadd.f32 1.0, %v675_v52  ;;  %696 = vtanh.f32 %v393_v49  ;;  %v381_v59 = vmul.f32 0.5, %v317_v54 }
  0xfc   : > { %v395_v60 = vmul.f32 0.5, %v359_v56  ;;  %v679_v61 = vpop.eup %678  ;;  %v427_v62 = vadd.f32 1.0, %v677_v57  ;;  %698 = vtanh.f32 %v380_v53 }
  0xfd   : > { %v681_v63 = vpop.eup %680  ;;  %v452_v0 = vmul.f32 0.5, %v426_v58  ;;  %v440_v1 = vadd.f32 1.0, %v679_v61  ;;  %700 = vtanh.f32 %v381_v59  ;;  %v321_v2 = vpop.f32.mrb[8].mxu0 }
  0xfe   : > { %v363_v3 = vpop.f32.mrb[8].mxu1  ;;  %v683_v4 = vpop.eup %682  ;;  %v453_v5 = vmul.f32 0.5, %v427_v62  ;;  %v441_v6 = vadd.f32 1.0, %v681_v63  ;;  %702 = vtanh.f32 %v394_v55  ;;  %v382_v7 = vmul.f32 0.5, %v321_v2 }
  0xff   : > { %v323_v8 = vpop.f32.mrb[9].mxu0  ;;  %v365_v9 = vpop.f32.mrb[9].mxu1  ;;  %478 = vst [vmem:[%s923_s26] sm:$0xff] %v452_v0  ;;  %v466_v11 = vmul.f32 0.5, %v440_v1  ;;  %v428_v12 = vadd.f32 1.0, %v683_v4  ;;  %704 = vtanh.f32 %v395_v60  ;;  %v396_v17 = vmul.f32 0.5, %v363_v3 }
 0x100   : > { %v685_v10 = vpop.eup %684  ;;  %v383_v13 = vmul.f32 0.5, %v323_v8  ;;  %480 = vst.msk [vmem:[%s923_s26 + $0x8] sm:$0xff] %vm479_vm1, %v453_v5  ;;  %v467_v15 = vmul.f32 0.5, %v441_v6  ;;  %706 = vtanh.f32 %v382_v7  ;;  %v397_v22 = vmul.f32 0.5, %v365_v9 }
 0x101   : > { %v687_v14 = vpop.eup %686  ;;  %v429_v16 = vadd.f32 1.0, %v685_v10  ;;  %493 = vst [vmem:[%s923_s26 + $0x70] sm:$0xff] %v466_v11  ;;  %v454_v19 = vmul.f32 0.5, %v428_v12  ;;  %v327_v21 = vpop.f32.mrb[10].mxu0 }
 0x102   : > { %v689_v18 = vpop.eup %688  ;;  %v442_v20 = vadd.f32 1.0, %v687_v14  ;;  %708 = vtanh.f32 %v383_v13  ;;  %v369_v23 = vpop.f32.mrb[10].mxu1  ;;  %494 = vst.msk [vmem:[%s923_s26 + $0x78] sm:$0xff] %vm479_vm1, %v467_v15  ;;  %v384_v27 = vmul.f32 0.5, %v327_v21 }
 0x103   : > { %v691_v24 = vpop.eup %690  ;;  %v455_v25 = vmul.f32 0.5, %v429_v16  ;;  %v443_v26 = vadd.f32 1.0, %v689_v18  ;;  %710 = vtanh.f32 %v396_v17  ;;  %v329_v28 = vpop.f32.mrb[11].mxu0  ;;  %481 = vst [vmem:[%s923_s26 + $0x10] sm:$0xff] %v454_v19  ;;  %v398_v37 = vmul.f32 0.5, %v369_v23 }
 0x104   : > { %v371_v29 = vpop.f32.mrb[11].mxu1  ;;  %v693_v30 = vpop.eup %692  ;;  %v468_v31 = vmul.f32 0.5, %v442_v20  ;;  %v430_v32 = vadd.f32 1.0, %v691_v24  ;;  %712 = vtanh.f32 %v397_v22  ;;  %v385_v33 = vmul.f32 0.5, %v329_v28 }
 0x105   : > { %v695_v34 = vpop.eup %694  ;;  %482 = vst.msk [vmem:[%s923_s26 + $0x18] sm:$0xff] %vm479_vm1, %v455_v25  ;;  %v469_v35 = vmul.f32 0.5, %v443_v26  ;;  %v431_v36 = vadd.f32 1.0, %v693_v30  ;;  %714 = vtanh.f32 %v384_v27  ;;  %v333_v41 = vpop.f32.mrb[12].mxu0  ;;  %v399_v42 = vmul.f32 0.5, %v371_v29 }
 0x106   : > { %v697_v38 = vpop.eup %696  ;;  %495 = vst [vmem:[%s923_s26 + $0x80] sm:$0xff] %v468_v31  ;;  %v456_v39 = vmul.f32 0.5, %v430_v32  ;;  %v444_v40 = vadd.f32 1.0, %v695_v34  ;;  %716 = vtanh.f32 %v385_v33  ;;  %v386_v46 = vmul.f32 0.5, %v333_v41  ;;  %v335_v47 = vpop.f32.mrb[13].mxu0 }
 0x107   : > { %v699_v43 = vpop.eup %698  ;;  %496 = vst.msk [vmem:[%s923_s26 + $0x88] sm:$0xff] %vm479_vm1, %v469_v35  ;;  %v457_v44 = vmul.f32 0.5, %v431_v36  ;;  %v445_v45 = vadd.f32 1.0, %v697_v38  ;;  %718 = vtanh.f32 %v398_v37  ;;  %v387_v51 = vmul.f32 0.5, %v335_v47 }
 0x108   : > { %v701_v48 = vpop.eup %700  ;;  %483 = vst [vmem:[%s923_s26 + $0x20] sm:$0xff] %v456_v39  ;;  %v470_v49 = vmul.f32 0.5, %v444_v40  ;;  %v432_v50 = vadd.f32 1.0, %v699_v43  ;;  %720 = vtanh.f32 %v399_v42 }
 0x109   : > { %v703_v52 = vpop.eup %702  ;;  %484 = vst.msk [vmem:[%s923_s26 + $0x28] sm:$0xff] %vm479_vm1, %v457_v44  ;;  %v471_v53 = vmul.f32 0.5, %v445_v45  ;;  %v433_v54 = vadd.f32 1.0, %v701_v48  ;;  %722 = vtanh.f32 %v386_v46 }
 0x10a   : > { %v705_v55 = vpop.eup %704  ;;  %497 = vst [vmem:[%s923_s26 + $0x90] sm:$0xff] %v470_v49  ;;  %v458_v56 = vmul.f32 0.5, %v432_v50  ;;  %v446_v57 = vadd.f32 1.0, %v703_v52  ;;  %724 = vtanh.f32 %v387_v51 }
 0x10b   : > { %v707_v58 = vpop.eup %706  ;;  %498 = vst.msk [vmem:[%s923_s26 + $0x98] sm:$0xff] %vm479_vm1, %v471_v53  ;;  %v459_v59 = vmul.f32 0.5, %v433_v54  ;;  %v447_v60 = vadd.f32 1.0, %v705_v55 }
 0x10c   : > { %v709_v61 = vpop.eup %708  ;;  %485 = vst [vmem:[%s923_s26 + $0x30] sm:$0xff] %v458_v56  ;;  %v472_v62 = vmul.f32 0.5, %v446_v57  ;;  %v434_v63 = vadd.f32 1.0, %v707_v58 }
 0x10d   : > { %v711_v0 = vpop.eup %710  ;;  %486 = vst.msk [vmem:[%s923_s26 + $0x38] sm:$0xff] %vm479_vm1, %v459_v59  ;;  %v473_v1 = vmul.f32 0.5, %v447_v60  ;;  %v435_v2 = vadd.f32 1.0, %v709_v61 }
 0x10e   : > { %v713_v3 = vpop.eup %712  ;;  %499 = vst [vmem:[%s923_s26 + $0xa0] sm:$0xff] %v472_v62  ;;  %v460_v4 = vmul.f32 0.5, %v434_v63  ;;  %v448_v5 = vadd.f32 1.0, %v711_v0 }
 0x10f   : > { %v715_v6 = vpop.eup %714  ;;  %500 = vst.msk [vmem:[%s923_s26 + $0xa8] sm:$0xff] %vm479_vm1, %v473_v1  ;;  %v461_v7 = vmul.f32 0.5, %v435_v2  ;;  %v449_v8 = vadd.f32 1.0, %v713_v3 }
 0x110   : > { %v717_v9 = vpop.eup %716  ;;  %487 = vst [vmem:[%s923_s26 + $0x40] sm:$0xff] %v460_v4  ;;  %v474_v10 = vmul.f32 0.5, %v448_v5  ;;  %v436_v11 = vadd.f32 1.0, %v715_v6 }
 0x111   : > { %v719_v12 = vpop.eup %718  ;;  %488 = vst.msk [vmem:[%s923_s26 + $0x48] sm:$0xff] %vm479_vm1, %v461_v7  ;;  %v475_v13 = vmul.f32 0.5, %v449_v8  ;;  %v437_v14 = vadd.f32 1.0, %v717_v9 }
 0x112   : > { %v721_v15 = vpop.eup %720  ;;  %501 = vst [vmem:[%s923_s26 + $0xb0] sm:$0xff] %v474_v10  ;;  %v462_v16 = vmul.f32 0.5, %v436_v11  ;;  %v450_v17 = vadd.f32 1.0, %v719_v12 }
 0x113   : > { %v723_v18 = vpop.eup %722  ;;  %502 = vst.msk [vmem:[%s923_s26 + $0xb8] sm:$0xff] %vm479_vm1, %v475_v13  ;;  %v463_v19 = vmul.f32 0.5, %v437_v14  ;;  %v451_v20 = vadd.f32 1.0, %v721_v15  ;;  %512 = sbr.rel (!%p847_p5) target bundleno = 310 (0x136), region = 32 }
 0x114   : > { %v725_v21 = vpop.eup %724  ;;  %489 = vst [vmem:[%s923_s26 + $0x50] sm:$0xff] %v462_v16  ;;  %v476_v22 = vmul.f32 0.5, %v450_v17  ;;  %v438_v23 = vadd.f32 1.0, %v723_v18 }
 0x115   : > { %490 = vst.msk [vmem:[%s923_s26 + $0x58] sm:$0xff] %vm479_vm1, %v463_v19  ;;  %v477_v24 = vmul.f32 0.5, %v451_v20  ;;  %v439_v25 = vadd.f32 1.0, %v725_v21 }
 0x116   : > { %503 = vst [vmem:[%s923_s26 + $0xc0] sm:$0xff] %v476_v22  ;;  %v464_v26 = vmul.f32 0.5, %v438_v23 }
 0x117   : > { %504 = vst.msk [vmem:[%s923_s26 + $0xc8] sm:$0xff] %vm479_vm1, %v477_v24  ;;  %v465_v27 = vmul.f32 0.5, %v439_v25 }
 0x118   : > { %491 = vst [vmem:[%s923_s26 + $0x60] sm:$0xff] %v464_v26 }
 0x119   : > { %492 = vst.msk [vmem:[%s923_s26 + $0x68] sm:$0xff] %vm479_vm1, %v465_v27 }
 0x11a   : > { %s1037_s29 = smov (!%p515_p11, %s514_s29), 13 }
 0x11b   : > { %s971_s30 = sshll.u32 %s1037_s29, 8 }
 0x11c   : > { %s520_s3 = ssub.s32 3328, %s971_s30 }
 0x11d   : > { %521 = vsyncadd %s966_s28, %s520_s3  ;;  %p609_p12 = scmp.ne.s32.totalorder %s971_s30, 0  ;;  %s619_s4 = smul.u32 3328, %s830_s13 }
 0x11e   : > { %s527_s5 = sshll.u32 %s923_s26, 4  ;;  %s791_s8 = smov [#allocation2]   ;;  %s983_s5 = int_to_ptr.vmem [resolvable:$true] %s527_s5 }
 0x11f   : > { %s981_s7 = scalar_lea.hbm %s1029_s2, %s619_s4  ;;  %s726_s27 = scalar_lea.vmem %s983_s5, %s971_s30 }
 0x120   : > { %p727_p13 = scmp.ne.s32.totalorder %s983_s5, %s726_s27  ;;  %s730_s14 = sshll.u32 %s791_s8, 4  ;;  %s731_s14 = int_to_ptr.vmem [resolvable:$false] %s730_s14 }
 0x121   : > { %s732_s13 = scalar_lea.vmem %s731_s14, 6656  ;;  %p733_p2 = scmp.lt.s32.totalorder %s983_s5, %s731_s14 }
 0x122   : > { %p728_p0 = pnand %p727_p13, %p609_p12  ;;  %p734_p3 = scmp.lt.s32.totalorder %s732_s13, %s726_s27 }
 0x124   : > { %p729_p1 = pneg %p728_p0  ;;  %p735_p4 = por %p734_p3, %p733_p2 }
 0x126   : > { %p736_p5 = pnand %p735_p4, %p729_p1 }
 0x128   : > { %739 = shalt.err (!%p736_p5)
}
 0x129   : > { %s740_s16 = scalar_lea.hbm %s981_s7, %s971_s30  ;;  %s744_s22 = scalar_lea.hbm %s1029_s2, 6400 }
 0x12a   : > { %p741_p7 = scmp.ne.s32.totalorder %s981_s7, %s740_s16  ;;  %p745_p10 = scmp.lt.u32.totalorder %s981_s7, %s1029_s2 }
 0x12b   : > { %p746_p11 = scmp.lt.u32.totalorder %s744_s22, %s740_s16  ;;  %p748_p0 = scmp.lt.u32.totalorder %s740_s16, %s981_s7 }
 0x12c   : > { %p742_p8 = pnand %p741_p7, %p609_p12 }
 0x12d   : > { %p747_p13 = por %p746_p11, %p745_p10 }
 0x12e   : > { %p743_p9 = pneg %p742_p8 }
 0x12f   : > { %p749_p1 = por %p748_p0, %p747_p13 }
 0x131   : > { %p750_p2 = pnand %p749_p1, %p743_p9 }
 0x133   : > { %753 = shalt.err (!%p750_p2)
}
 0x134   : > { %s792_s25 = smov 256   ;;  %s793_s26 = smov 16  }
 0x135   : > { %533 = dma.vmem_to_hbm [thread:$0]  (%p609_p12), %s983_s5, %s971_s30, %s981_s7, %s966_s28, %s792_s25, %s792_s25, %s793_s26  }
 0x136 PF: > { %p638_p3 = scmp.ge.s32.totalorder %s788_s12, 2  ;;  %s542_s29 = sand.u32 1, %s776_s9  }
 0x137   : > { %s543_s3 = scalar_lea.sflag [#allocation3], %s542_s29 }
 0x138   : > { %p635_p4 = pnand %p638_p3, %p851_p6 }
 0x13a   : > { %771 = dma.done.wait (!%p635_p4), %s543_s3, 3328  }
 0x13b   : > { %773 = vsyncadd (!%p635_p4), %s543_s3, 4294963968  ;;  %p12_p5 = scmp.ge.s32.totalorder %s834_s15, 4   ;;  %s1032_s9 = smov %s780_s10 }
 0x13c   : > { %s1033_s10 = smov %s784_s11  ;;  %s1034_s11 = smov %s845_s18 }
 0x13d   : > { %s1035_s12 = smov %s834_s15  ;;  %14 = sbr.rel (!%p12_p5) target bundleno = 3 (0x3), region = 63 }
 0x144   :  { %548 = vsyncpa [#allocation3], 1 }
 0x145   :  { %550 = vsyncpa [#allocation3 + $0x1], 1 }

</bundles_post_ra>
